<compile_context>
chip_gen: v6e
topology: v6e:2x2x1
jax: 0.10.0
libtpu: 0.0.40
codegen_flags: <defaults>
</compile_context>

<pallas_src>
import numpy as np
import jax
import jax.numpy as jnp
from jax.experimental import pallas as pl
from jax.experimental.pallas import tpu as pltpu

_LANES = 128  # vreg lane width; keep the output slab lane-dense.


def _mix32(x):
    """murmur3 fmix32-style avalanche finalizer on uint32 values."""
    x = x ^ (x >> jnp.uint32(16))
    x = x * jnp.uint32(0x85EBCA6B)
    x = x ^ (x >> jnp.uint32(13))
    x = x * jnp.uint32(0xC2B2AE35)
    x = x ^ (x >> jnp.uint32(16))
    return x


def _gen_noise_kernel(seed_ref, o_ref):
    """Fill this (tile_rows, 128) output tile with i.i.d. N(0,1) samples.

    seed_ref : SMEM scalar-prefetch ref, shape (1,), int32 base seed.
    o_ref    : VMEM output tile ref, (tile_rows, 128), dtype == x.dtype.
    """
    tile_r, lanes = o_ref.shape
    i = pl.program_id(0).astype(jnp.uint32)

    # Global linear element index of every slot in this tile (counter).
    row = jax.lax.broadcasted_iota(jnp.int32, (tile_r, lanes), 0).astype(jnp.uint32)
    col = jax.lax.broadcasted_iota(jnp.int32, (tile_r, lanes), 1).astype(jnp.uint32)
    base = (i * jnp.uint32(tile_r) + row) * jnp.uint32(lanes) + col

    # Derive two independent stream keys from the user seed (scalar ops).
    seed = seed_ref[0].astype(jnp.uint32)
    k1 = _mix32(seed + jnp.uint32(0x243F6A88))
    k2 = _mix32(seed + jnp.uint32(0xB7E15162))

    # Two independent 32-bit hashes per element.
    bits1 = _mix32(base ^ k1)
    bits2 = _mix32(base ^ k2)

    # 24-bit uniforms: u1 in (0, 1] (safe for log), u2 in [0, 1).
    inv24 = jnp.float32(1.0 / (1 << 24))
    u1 = ((bits1 >> jnp.uint32(8)).astype(jnp.int32).astype(jnp.float32) + 1.0) * inv24
    u2 = (bits2 >> jnp.uint32(8)).astype(jnp.int32).astype(jnp.float32) * inv24

    # Box-Muller transform -> exact N(0, 1) samples (computed in f32).
    r = jnp.sqrt(jnp.float32(-2.0) * jnp.log(u1))
    theta = jnp.float32(2.0 * np.pi) * u2
    z = r * jnp.cos(theta)

    # Cast in-kernel so low-precision outputs only ever store their own width.
    o_ref[...] = z.astype(o_ref.dtype)


def gen_noise(x, dim2, *, seed=0, tile_rows=2048):
    """Pallas equivalent of GenNoise(dim2).forward(x).

    x    : array of shape (N, C, *spatial); only shape/dtype are used.
    dim2 : replacement for the channel dimension.
    Returns an array of shape (N, dim2, *spatial), dtype == x.dtype, filled
    with standard-normal noise generated in the kernel.
    """
    out_shape = (x.shape[0], dim2) + tuple(x.shape[2:])
    total = int(np.prod(out_shape))
    dtype = x.dtype

    rows = (total + _LANES - 1) // _LANES
    # Exact-fit path: output slab is exactly total elements -> reshape is
    # metadata-only, no trim copy.  (Common NCHW case: H*W multiple of 128.)
    exact = (rows * _LANES == total) and (rows % 8 == 0)
    rows_alloc = rows if exact else ((rows + 7) // 8) * 8  # sublane-align

    tile = min(int(tile_rows), rows_alloc)
    tile = max(8, (tile // 8) * 8)  # keep block sublane-aligned
    grid = (pl.cdiv(rows_alloc, tile),)

    seed_arr = jnp.asarray([seed], dtype=jnp.int32)

    # NOTE(v5e): if profiling shows the output writeback exposed, add
    # pipeline_mode=pl.Buffered(3) to out_specs; default double-buffer is
    # fine for v6e/v7x where the kernel is transcendental-bound.
    noise2d = pl.pallas_call(
        _gen_noise_kernel,
        out_shape=jax.ShapeDtypeStruct((rows_alloc, _LANES), dtype),
        grid_spec=pltpu.PrefetchScalarGridSpec(
            num_scalar_prefetch=1,
            grid=grid,
            in_specs=[],
            out_specs=pl.BlockSpec((tile, _LANES), lambda i, seed_ref: (i, 0)),
        ),
        compiler_params=pltpu.CompilerParams(
            # Stateless counter-based PRNG -> grid steps are independent;
            # "parallel" lets v7x shard the axis across its two TensorCores.
            dimension_semantics=("parallel",),
        ),
    )(seed_arr)

    if exact:
        return noise2d.reshape(out_shape)
    flat = noise2d.reshape(-1)[:total]
    return flat.reshape(out_shape)


if __name__ == "__main__":
    key = jax.random.PRNGKey(0)
    # Small NCHW input consistent with the module's typical use.
    x = jax.random.normal(key, (2, 4, 16, 16), dtype=jnp.float32)
    dim2 = 8

    out = gen_noise(x, dim2, seed=1234)
    out = jax.block_until_ready(out)

    # Sanity checks: shape/dtype semantics of GenNoise, and roughly N(0,1).
    assert out.shape == (2, dim2, 16, 16), out.shape
    assert out.dtype == x.dtype, out.dtype
    assert bool(jnp.all(jnp.isfinite(out)))
    m = float(jnp.mean(out))
    s = float(jnp.std(out))
    assert abs(m) < 0.2 and 0.8 < s < 1.2, (m, s)

    print("KERNEL_OK")
</pallas_src>

<mosaic_0001>
module attributes {stable_mosaic.version = 11 : i64} {
  func.func @_gen_noise_kernel(%arg0: i32, %arg1: memref<1xi32, #tpu.memory_space<smem>>, %arg2: memref<32x128xf32, #tpu.memory_space<vmem>>) attributes {dimension_semantics = [#tpu.dimension_semantics<parallel>], iteration_bounds = array<i64: 1>, scalar_prefetch = 1 : i64, scratch_operands = 0 : i64, tpu.core_type = #tpu.core_type<tc>, window_params = [{transform_indices = @transform_0, window_bounds = array<i64: 32, 128>}]} {
    %0 = tpu.iota {dimensions = array<i32: 0>} : vector<32x128xi32>
    %1 = tpu.iota {dimensions = array<i32: 1>} : vector<32x128xi32>
    %c32_i32 = arith.constant 32 : i32
    %2 = arith.muli %arg0, %c32_i32 : i32
    %3 = vector.broadcast %2 : i32 to vector<32x128xi32>
    %4 = arith.addi %3, %0 : vector<32x128xi32>
    %c128_i32 = arith.constant 128 : i32
    %5 = vector.broadcast %c128_i32 : i32 to vector<32x128xi32>
    %6 = arith.muli %4, %5 : vector<32x128xi32>
    %7 = arith.addi %6, %1 : vector<32x128xi32>
    %c0 = arith.constant 0 : index
    %8 = memref.load %arg1[%c0] : memref<1xi32, #tpu.memory_space<smem>>
    %c608135816_i32 = arith.constant 608135816 : i32
    %9 = arith.addi %8, %c608135816_i32 : i32
    %c16_i32 = arith.constant 16 : i32
    %10 = arith.shrui %9, %c16_i32 : i32
    %11 = arith.xori %9, %10 : i32
    %c-2048144789_i32 = arith.constant -2048144789 : i32
    %12 = arith.muli %11, %c-2048144789_i32 : i32
    %c13_i32 = arith.constant 13 : i32
    %13 = arith.shrui %12, %c13_i32 : i32
    %14 = arith.xori %12, %13 : i32
    %c-1028477387_i32 = arith.constant -1028477387 : i32
    %15 = arith.muli %14, %c-1028477387_i32 : i32
    %c16_i32_0 = arith.constant 16 : i32
    %16 = arith.shrui %15, %c16_i32_0 : i32
    %17 = arith.xori %15, %16 : i32
    %c-1209970334_i32 = arith.constant -1209970334 : i32
    %18 = arith.addi %8, %c-1209970334_i32 : i32
    %c16_i32_1 = arith.constant 16 : i32
    %19 = arith.shrui %18, %c16_i32_1 : i32
    %20 = arith.xori %18, %19 : i32
    %c-2048144789_i32_2 = arith.constant -2048144789 : i32
    %21 = arith.muli %20, %c-2048144789_i32_2 : i32
    %c13_i32_3 = arith.constant 13 : i32
    %22 = arith.shrui %21, %c13_i32_3 : i32
    %23 = arith.xori %21, %22 : i32
    %c-1028477387_i32_4 = arith.constant -1028477387 : i32
    %24 = arith.muli %23, %c-1028477387_i32_4 : i32
    %c16_i32_5 = arith.constant 16 : i32
    %25 = arith.shrui %24, %c16_i32_5 : i32
    %26 = arith.xori %24, %25 : i32
    %27 = vector.broadcast %17 : i32 to vector<32x128xi32>
    %28 = arith.xori %7, %27 : vector<32x128xi32>
    %c16_i32_6 = arith.constant 16 : i32
    %29 = vector.broadcast %c16_i32_6 : i32 to vector<32x128xi32>
    %30 = arith.shrui %28, %29 : vector<32x128xi32>
    %31 = arith.xori %28, %30 : vector<32x128xi32>
    %c-2048144789_i32_7 = arith.constant -2048144789 : i32
    %32 = vector.broadcast %c-2048144789_i32_7 : i32 to vector<32x128xi32>
    %33 = arith.muli %31, %32 : vector<32x128xi32>
    %c13_i32_8 = arith.constant 13 : i32
    %34 = vector.broadcast %c13_i32_8 : i32 to vector<32x128xi32>
    %35 = arith.shrui %33, %34 : vector<32x128xi32>
    %36 = arith.xori %33, %35 : vector<32x128xi32>
    %c-1028477387_i32_9 = arith.constant -1028477387 : i32
    %37 = vector.broadcast %c-1028477387_i32_9 : i32 to vector<32x128xi32>
    %38 = arith.muli %36, %37 : vector<32x128xi32>
    %c16_i32_10 = arith.constant 16 : i32
    %39 = vector.broadcast %c16_i32_10 : i32 to vector<32x128xi32>
    %40 = arith.shrui %38, %39 : vector<32x128xi32>
    %41 = arith.xori %38, %40 : vector<32x128xi32>
    %42 = vector.broadcast %26 : i32 to vector<32x128xi32>
    %43 = arith.xori %7, %42 : vector<32x128xi32>
    %c16_i32_11 = arith.constant 16 : i32
    %44 = vector.broadcast %c16_i32_11 : i32 to vector<32x128xi32>
    %45 = arith.shrui %43, %44 : vector<32x128xi32>
    %46 = arith.xori %43, %45 : vector<32x128xi32>
    %c-2048144789_i32_12 = arith.constant -2048144789 : i32
    %47 = vector.broadcast %c-2048144789_i32_12 : i32 to vector<32x128xi32>
    %48 = arith.muli %46, %47 : vector<32x128xi32>
    %c13_i32_13 = arith.constant 13 : i32
    %49 = vector.broadcast %c13_i32_13 : i32 to vector<32x128xi32>
    %50 = arith.shrui %48, %49 : vector<32x128xi32>
    %51 = arith.xori %48, %50 : vector<32x128xi32>
    %c-1028477387_i32_14 = arith.constant -1028477387 : i32
    %52 = vector.broadcast %c-1028477387_i32_14 : i32 to vector<32x128xi32>
    %53 = arith.muli %51, %52 : vector<32x128xi32>
    %c16_i32_15 = arith.constant 16 : i32
    %54 = vector.broadcast %c16_i32_15 : i32 to vector<32x128xi32>
    %55 = arith.shrui %53, %54 : vector<32x128xi32>
    %56 = arith.xori %53, %55 : vector<32x128xi32>
    %c8_i32 = arith.constant 8 : i32
    %57 = vector.broadcast %c8_i32 : i32 to vector<32x128xi32>
    %58 = arith.shrui %41, %57 : vector<32x128xi32>
    %59 = arith.sitofp %58 : vector<32x128xi32> to vector<32x128xf32>
    %cst = arith.constant 1.000000e+00 : f32
    %60 = vector.broadcast %cst : f32 to vector<32x128xf32>
    %61 = arith.addf %59, %60 : vector<32x128xf32>
    %cst_16 = arith.constant 5.96046448E-8 : f32
    %62 = vector.broadcast %cst_16 : f32 to vector<32x128xf32>
    %63 = arith.mulf %61, %62 : vector<32x128xf32>
    %c8_i32_17 = arith.constant 8 : i32
    %64 = vector.broadcast %c8_i32_17 : i32 to vector<32x128xi32>
    %65 = arith.shrui %56, %64 : vector<32x128xi32>
    %66 = arith.sitofp %65 : vector<32x128xi32> to vector<32x128xf32>
    %cst_18 = arith.constant 5.96046448E-8 : f32
    %67 = vector.broadcast %cst_18 : f32 to vector<32x128xf32>
    %68 = arith.mulf %66, %67 : vector<32x128xf32>
    %69 = math.log %63 : vector<32x128xf32>
    %cst_19 = arith.constant -2.000000e+00 : f32
    %70 = vector.broadcast %cst_19 : f32 to vector<32x128xf32>
    %71 = arith.mulf %70, %69 : vector<32x128xf32>
    %72 = math.sqrt %71 : vector<32x128xf32>
    %cst_20 = arith.constant 6.28318548 : f32
    %73 = vector.broadcast %cst_20 : f32 to vector<32x128xf32>
    %74 = arith.mulf %73, %68 : vector<32x128xf32>
    %75 = math.cos %74 : vector<32x128xf32>
    %76 = arith.mulf %72, %75 : vector<32x128xf32>
    %c0_21 = arith.constant 0 : index
    %c0_22 = arith.constant 0 : index
    %77 = vector.load %arg2[%c0_21, %c0_22] : memref<32x128xf32, #tpu.memory_space<vmem>>, vector<32x128xf32>
    tpu.vector_store %arg2[%c0_21, %c0_22], %76 {strides = array<i32>} : memref<32x128xf32, #tpu.memory_space<vmem>>, vector<32x128xf32>,
    return
  }
  func.func @transform_0(%arg0: i32, %arg1: memref<1xi32, #tpu.memory_space<smem>>) -> (i32, i32) {
    %c0_i32 = arith.constant 0 : i32
    %c0_i32_0 = arith.constant 0 : i32
    return %arg0, %c0_i32 : i32, i32
  }
}

</mosaic_0001>

<bundles_post_ra>
// kernel: tpu_custom_call.1
= control target key start
LH: loop header
LB: loop body
LE: loop exit
PB: predicated region body
PF: predicated region fallthrough
CT: control target
= control target key end

     0   :  { %7 = vsyncpa [#allocation5], 0  ;;  %v8_v0 = vlaneseq  ;;  %s731_s27 = smov [#allocation4]   ;;  %s1097_s0 = inlined_call_operand.<no memory space> [shape: s32[1], index: 0, kind: input, shape index: {}]   ;;  %s1098_s1 = inlined_call_operand.hbm [shape: f32[32,128], index: 1, kind: output, shape index: {}]  }
   0x1   :  { %s30_s8 = sadd.s32 608135816, %s1097_s0  ;;  %s39_s11 = sadd.s32 3084996962, %s1097_s0 }
   0x2   :  { %s31_s12 = sshrl.u32 %s30_s8, 16  ;;  %s40_s13 = sshrl.u32 %s39_s11, 16  ;;  %v9_v1 = vshrl.u32 %v8_v0, 7  ;;  %v14_v6 = vand.u32 127, %v8_v0 }
   0x3   :  { %s32_s14 = sxor.u32 %s31_s12, %s30_s8  ;;  %s41_s15 = sxor.u32 %s40_s13, %s39_s11 }
   0x4   :  { %s33_s16 = smul.u32 2246822507, %s32_s14  ;;  %v10_v2 = vadd.s32 8, %v9_v1  ;;  %v11_v3 = vadd.s32 16, %v9_v1  ;;  %v12_v4 = vadd.s32 24, %v9_v1  ;;  %v21_v5 = vmul.u32 128, %v9_v1 }
   0x5   :  { %s42_s17 = smul.u32 2246822507, %s41_s15  ;;  %s619_s28 = sshll.u32 %s731_s27, 4  ;;  %s620_s28 = int_to_ptr.vmem [resolvable:$true] %s619_s28 }
   0x6   :  { %s34_s18 = sshrl.u32 %s33_s16, 13  ;;  %v22_v7 = vmul.u32 128, %v10_v2  ;;  %v23_v8 = vmul.u32 128, %v11_v3  ;;  %v25_v10 = vadd.s32 %v21_v5, %v14_v6  ;;  %s703_s29 = scalar_lea.vmem %s620_s28, 512 }
   0x7   :  { %s35_s19 = sxor.u32 %s34_s18, %s33_s16  ;;  %s43_s20 = sshrl.u32 %s42_s17, 13  ;;  %v24_v9 = vmul.u32 128, %v12_v4 }
   0x8   :  { %s36_s21 = smul.u32 3266489909, %s35_s19  ;;  %s44_s22 = sxor.u32 %s43_s20, %s42_s17  ;;  %v26_v11 = vadd.s32 %v22_v7, %v14_v6  ;;  %v27_v12 = vadd.s32 %v23_v8, %v14_v6 }
   0x9   :  { %s45_s0 = smul.u32 3266489909, %s44_s22  ;;  %v28_v17 = vadd.s32 %v24_v9, %v14_v6  ;;  %p704_p0 = scmp.ne.s32.totalorder %s620_s28, %s703_s29 }
   0xa   :  { %s37_s23 = sshrl.u32 %s36_s21, 16  ;;  %p708_p1 = scmp.lt.s32.totalorder %s620_s28, %s620_s28 }
   0xb   :  { %s38_s24 = sxor.u32 %s37_s23, %s36_s21  ;;  %s46_s25 = sshrl.u32 %s45_s0, 16 }
   0xc   :  { %s47_s26 = sxor.u32 %s46_s25, %s45_s0  ;;  %v48_v13 = vstv %s38_s24  ;;  %p709_p2 = scmp.lt.s32.totalorder %s703_s29, %s703_s29 }
   0xd   :  { %v49_v14 = vxor.u32 %v48_v13, %v25_v10  ;;  %v50_v15 = vxor.u32 %v48_v13, %v26_v11  ;;  %v51_v16 = vxor.u32 %v48_v13, %v27_v12  ;;  %v85_v18 = vstv %s47_s26 }
   0xe   :  { %v86_v21 = vxor.u32 %v85_v18, %v25_v10  ;;  %v87_v22 = vxor.u32 %v85_v18, %v26_v11  ;;  %v88_v23 = vxor.u32 %v85_v18, %v27_v12  ;;  %v52_v24 = vxor.u32 %v48_v13, %v28_v17  ;;  %p710_p3 = por %p709_p2, %p708_p1 }
   0xf   :  { %v53_v19 = vshrl.u32 %v49_v14, 16  ;;  %v54_v20 = vshrl.u32 %v50_v15, 16  ;;  %v55_v25 = vshrl.u32 %v51_v16, 16  ;;  %v89_v28 = vxor.u32 %v85_v18, %v28_v17 }
  0x10   :  { %v90_v29 = vshrl.u32 %v86_v21, 16  ;;  %v91_v30 = vshrl.u32 %v87_v22, 16  ;;  %v92_v31 = vshrl.u32 %v88_v23, 16  ;;  %v56_v35 = vshrl.u32 %v52_v24, 16  ;;  %p711_p4 = pnand %p710_p3, %p704_p0 }
  0x11   :  { %v57_v26 = vxor.u32 %v53_v19, %v49_v14  ;;  %v58_v27 = vxor.u32 %v54_v20, %v50_v15  ;;  %v59_v36 = vxor.u32 %v55_v25, %v51_v16  ;;  %v93_v39 = vshrl.u32 %v89_v28, 16 }
  0x12   :  { %v94_v33 = vxor.u32 %v90_v29, %v86_v21  ;;  %v95_v34 = vxor.u32 %v91_v30, %v87_v22  ;;  %v96_v38 = vxor.u32 %v92_v31, %v88_v23  ;;  %v60_v46 = vxor.u32 %v56_v35, %v52_v24 }
  0x13   :  { %v61_v32 = vmul.u32 2246822507, %v57_v26  ;;  %v62_v37 = vmul.u32 2246822507, %v58_v27  ;;  %v97_v50 = vxor.u32 %v93_v39, %v89_v28 }
  0x14   :  { %v98_v40 = vmul.u32 2246822507, %v94_v33  ;;  %v99_v41 = vmul.u32 2246822507, %v95_v34 }
  0x15   :  { %v65_v42 = vshrl.u32 %v61_v32, 13  ;;  %v100_v43 = vmul.u32 2246822507, %v96_v38  ;;  %v63_v47 = vmul.u32 2246822507, %v59_v36  ;;  %v66_v49 = vshrl.u32 %v62_v37, 13 }
  0x16   :  { %v102_v44 = vshrl.u32 %v98_v40, 13  ;;  %v103_v45 = vshrl.u32 %v99_v41, 13  ;;  %v64_v56 = vmul.u32 2246822507, %v60_v46  ;;  %v101_v60 = vmul.u32 2246822507, %v97_v50 }
  0x17   :  { %v104_v48 = vshrl.u32 %v100_v43, 13  ;;  %v69_v53 = vxor.u32 %v65_v42, %v61_v32  ;;  %v67_v57 = vshrl.u32 %v63_v47, 13  ;;  %v70_v59 = vxor.u32 %v66_v49, %v62_v37 }
  0x18   :  { %v106_v51 = vxor.u32 %v102_v44, %v98_v40  ;;  %v107_v52 = vxor.u32 %v103_v45, %v99_v41  ;;  %v68_v2 = vshrl.u32 %v64_v56, 13  ;;  %v105_v6 = vshrl.u32 %v101_v60, 13 }
  0x19   :  { %v108_v58 = vxor.u32 %v104_v48, %v100_v43  ;;  %v73_v63 = vmul.u32 3266489909, %v69_v53  ;;  %v71_v3 = vxor.u32 %v67_v57, %v63_v47  ;;  %v74_v5 = vmul.u32 3266489909, %v70_v59 }
  0x1a   :  { %v110_v54 = vmul.u32 3266489909, %v106_v51  ;;  %v111_v55 = vmul.u32 3266489909, %v107_v52  ;;  %v72_v12 = vxor.u32 %v68_v2, %v64_v56  ;;  %v109_v16 = vxor.u32 %v105_v6, %v101_v60 }
  0x1b   :  { %v112_v4 = vmul.u32 3266489909, %v108_v58  ;;  %v77_v9 = vshrl.u32 %v73_v63, 16  ;;  %v75_v13 = vmul.u32 3266489909, %v71_v3  ;;  %v78_v15 = vshrl.u32 %v74_v5, 16 }
  0x1c   :  { %v114_v61 = vshrl.u32 %v110_v54, 16  ;;  %v115_v62 = vshrl.u32 %v111_v55, 16  ;;  %v76_v22 = vmul.u32 3266489909, %v72_v12  ;;  %v113_v26 = vmul.u32 3266489909, %v109_v16 }
  0x1d   :  { %v116_v14 = vshrl.u32 %v112_v4, 16  ;;  %v81_v19 = vxor.u32 %v77_v9, %v73_v63  ;;  %v79_v24 = vshrl.u32 %v75_v13, 16  ;;  %v82_v25 = vxor.u32 %v78_v15, %v74_v5 }
  0x1e   :  { %v118_v0 = vxor.u32 %v114_v61, %v110_v54  ;;  %v119_v1 = vxor.u32 %v115_v62, %v111_v55  ;;  %v80_v31 = vshrl.u32 %v76_v22, 16  ;;  %v117_v35 = vshrl.u32 %v113_v26, 16 }
  0x1f   :  { %v120_v23 = vxor.u32 %v116_v14, %v112_v4  ;;  %v122_v28 = vshrl.u32 %v81_v19, 8  ;;  %v83_v34 = vxor.u32 %v79_v24, %v75_v13  ;;  %v123_v36 = vshrl.u32 %v82_v25, 8 }
  0x20   :  { %v138_v7 = vshrl.u32 %v118_v0, 8  ;;  %v139_v8 = vshrl.u32 %v119_v1, 8  ;;  %v84_v40 = vxor.u32 %v80_v31, %v76_v22  ;;  %v121_v43 = vxor.u32 %v117_v35, %v113_v26 }
  0x21   :  { %v140_v32 = vshrl.u32 %v120_v23, 8  ;;  %v126_v38 = vcvt.s32.f32 %v122_v28  ;;  %v124_v44 = vshrl.u32 %v83_v34, 8  ;;  %v127_v45 = vcvt.s32.f32 %v123_v36 }
  0x22   :  { %v142_v10 = vcvt.s32.f32 %v138_v7  ;;  %v143_v11 = vcvt.s32.f32 %v139_v8  ;;  %v125_v50 = vshrl.u32 %v84_v40, 8  ;;  %v141_v55 = vshrl.u32 %v121_v43, 8 }
  0x23   :  { %v144_v41 = vcvt.s32.f32 %v140_v32  ;;  %v130_v46 = vadd.f32 1.0, %v126_v38  ;;  %v128_v53 = vcvt.s32.f32 %v124_v44  ;;  %v131_v54 = vadd.f32 1.0, %v127_v45 }
  0x24   :  { %v146_v17 = vmul.f32 5.9604645e-08, %v142_v10  ;;  %v147_v18 = vmul.f32 5.9604645e-08, %v143_v11  ;;  %v725_v61 = vmov 683565275   ;;  %v726_v63 = vmov 2475754826  }
  0x25   :  { %v148_v51 = vmul.f32 5.9604645e-08, %v144_v41  ;;  %v134_v57 = vmul.f32 5.9604645e-08, %v130_v46  ;;  %v764_v1 = vcvt.s32.f32 %v125_v50  ;;  %v132_v2 = vadd.f32 1.0, %v128_v53 }
  0x26   :  { %v750_v20 = vmul.f32 6.2831855, %v146_v17  ;;  %v752_v21 = vmul.f32 6.2831855, %v147_v18  ;;  %v135_v3 = vmul.f32 5.9604645e-08, %v131_v54  ;;  %v145_v4 = vcvt.s32.f32 %v141_v55 }
  0x27   :  { %v760_v60 = vmul.f32 6.2831855, %v148_v51  ;;  %671 = vlog2.f32 %v134_v57  ;;  %v727_v9 = vmov 2131351028   ;;  %v728_v11 = vmov 2102212464  }
  0x28   :  { %v197_v27 = vand.u32 2139095040, %v750_v20  ;;  %v300_v29 = vand.u32 2139095040, %v752_v21  ;;  %v194_v48 = vand.u32 2147483647, %v750_v20  ;;  %v297_v58 = vand.u32 2147483647, %v752_v21 }
  0x29   :  { %v403_v17 = vand.u32 2139095040, %v760_v60  ;;  %v729_v19 = vmov 920167782   ;;  %v730_v24 = vmov 1326507024   ;;  %673 = vlog2.f32 %v135_v3 }
  0x2a   :  { %v198_v30 = vshrl.u32 %v197_v27, 23  ;;  %v301_v33 = vshrl.u32 %v300_v29, 23  ;;  %v201_v59 = vand.u32 8388607, %v194_v48  ;;  %v769_v7 = vand.u32 8388607, %v297_v58 }
  0x2b   :  { %v404_v45 = vshrl.u32 %v403_v17, 23 }
  0x2c   :  { %v630_v37 = vadd.s32 4294967169, %v198_v30  ;;  %v634_v42 = vadd.s32 4294967169, %v301_v33  ;;  %v202_v8 = vor.u32 8388608, %v201_v59 }
  0x2d   :  { %v638_v3 = vadd.s32 4294967169, %v404_v45 }
  0x2e   :  { %v204_v39 = vadd.s32 1, %v630_v37  ;;  %v307_v52 = vadd.s32 1, %v634_v42  ;;  %v242_v33 = vshll.u32 %v202_v8, 8  ;;  %v783_v42 = vmul.f32 5.9604645e-08, %v132_v2 }
  0x30   :  { %vm205_vm0 = vcmp.gt.s32.totalorder %v204_v39, 0  ;;  %vm308_vm1 = vcmp.gt.s32.totalorder %v307_v52, 0 }
  0x31   :  { %v206_v47 = vsel %vm205_vm0, %v204_v39, 0  ;;  %v309_v13 = vsel %vm308_vm1, %v307_v52, 0  ;;  %v305_v52 = vor.u32 8388608, %v769_v7 }
  0x32   :  { %v208_v49 = vand.u32 31, %v206_v47  ;;  %v207_v5 = vshrl.u32 %v206_v47, 5  ;;  %v311_v27 = vand.u32 31, %v309_v13  ;;  %v310_v7 = vshrl.u32 %v309_v13, 5 }
  0x34   :  { %v209_v56 = vsub.s32 32, %v208_v49  ;;  %v211_v62 = vshll.u32 %v725_v61, %v208_v49  ;;  %v214_v6 = vshll.u32 %v726_v63, %v208_v49  ;;  %v217_v10 = vshll.u32 %v727_v9, %v208_v49  ;;  %v672_v59 = vpop.eup %671 }
  0x35   :  { %v220_v12 = vshll.u32 %v728_v11, %v208_v49  ;;  %v223_v23 = vshll.u32 %v729_v19, %v208_v49  ;;  %vm226_vm2 = vcmp.lt.s32.totalorder %v207_v5, 1  ;;  %vm228_vm3 = vcmp.lt.s32.totalorder %v207_v5, 3 }
  0x36   :  { %v212_v0 = vshrl.u32 %v726_v63, %v209_v56  ;;  %v210_v14 = vshrl.u32 %v725_v61, %v209_v56  ;;  %v215_v16 = vshrl.u32 %v727_v9, %v209_v56  ;;  %v218_v18 = vshrl.u32 %v728_v11, %v209_v56 }
  0x37   :  { %v221_v22 = vshrl.u32 %v729_v19, %v209_v56  ;;  %v224_v25 = vshrl.u32 %v730_v24, %v209_v56  ;;  %vm229_vm4 = vcmp.lt.s32.totalorder %v207_v5, 4  ;;  %vm227_vm5 = vcmp.lt.s32.totalorder %v207_v5, 2 }
  0x38   :  { %v213_v15 = vor.u32 %v212_v0, %v211_v62  ;;  %v216_v26 = vor.u32 %v215_v16, %v214_v6  ;;  %v219_v28 = vor.u32 %v218_v18, %v217_v10  ;;  %v312_v41 = vsub.s32 32, %v311_v27 }
  0x39   :  { %v222_v29 = vor.u32 %v221_v22, %v220_v12  ;;  %v225_v30 = vor.u32 %v224_v25, %v223_v23  ;;  %v314_v53 = vshll.u32 %v725_v61, %v311_v27  ;;  %v317_v55 = vshll.u32 %v726_v63, %v311_v27 }
  0x3a   :  { %v230_v31 = vsel %vm226_vm2, %v210_v14, %v213_v15  ;;  %v234_v32 = vsel %vm226_vm2, %v213_v15, %v216_v26  ;;  %v231_v34 = vsel %vm229_vm4, %v219_v28, 2102212464  ;;  %v238_v36 = vsel %vm226_vm2, %v216_v26, %v219_v28 }
  0x3b   :  { %v235_v35 = vsel %vm229_vm4, %v222_v29, 920167782  ;;  %v239_v37 = vsel %vm229_vm4, %v225_v30, 1326507024  ;;  %v232_v38 = vsel %vm228_vm3, %v216_v26, %v231_v34  ;;  %v315_v54 = vshrl.u32 %v726_v63, %v312_v41 }
  0x3c   :  { %v236_v39 = vsel %vm228_vm3, %v219_v28, %v235_v35  ;;  %v240_v40 = vsel %vm228_vm3, %v222_v29, %v239_v37  ;;  %v233_v51 = vsel %vm227_vm5, %v230_v31, %v232_v38  ;;  %v318_v56 = vshrl.u32 %v727_v9, %v312_v41 }
  0x3d   :  { %v237_v43 = vsel %vm227_vm5, %v234_v32, %v236_v39  ;;  %v241_v44 = vsel %vm227_vm5, %v238_v36, %v240_v40  ;;  %v323_v57 = vshll.u32 %v728_v11, %v311_v27  ;;  %v320_v62 = vshll.u32 %v727_v9, %v311_v27 }
  0x3e   :  { %v787_v46 = vmul.u32.u64.low %v242_v33, %v241_v44  ;;  %v788_v47 = vmul.u32.u64.high %v242_v33, %v241_v44, %v787_v46  ;;  %v790_v49 = vmul.u32.u64.low %v242_v33, %v237_v43  ;;  %v791_v50 = vmul.u32.u64.high %v242_v33, %v237_v43, %v790_v49 }
  0x3f   :  { %v321_v0 = vshrl.u32 %v728_v11, %v312_v41  ;;  %v324_v2 = vshrl.u32 %v729_v19, %v312_v41  ;;  %v149_v5 = vmul.f32 5.9604645e-08, %v145_v4  ;;  %v249_v6 = vmul.u32 %v242_v33, %v233_v51  ;;  %v674_v46 = vpop.eup %673 }
  0x40   :  { %vm251_vm6 = vc.u32 %v788_v47, %v790_v49  ;;  %v252_v8 = vadd.s32 1, %v791_v50  ;;  %v313_v10 = vshrl.u32 %v725_v61, %v312_v41  ;;  %v326_v12 = vshll.u32 %v729_v19, %v311_v27 }
  0x41   :  { %v400_v14 = vand.u32 2147483647, %v760_v60  ;;  %v316_v15 = vor.u32 %v315_v54, %v314_v53  ;;  %v319_v16 = vor.u32 %v318_v56, %v317_v55  ;;  %v325_v17 = vor.u32 %v324_v2, %v323_v57 }
  0x42   :  { %v345_v18 = vshll.u32 %v305_v52, 8  ;;  %v253_v22 = vsel %vm251_vm6, %v252_v8, %v791_v50  ;;  %v322_v4 = vor.u32 %v321_v0, %v320_v62  ;;  %v327_v23 = vshrl.u32 %v730_v24, %v312_v41 }
  0x43   :  { %v410_v25 = vadd.s32 1, %v638_v3  ;;  %v151_v26 = vmul.f32 0.6931472, %v672_v59  ;;  %v254_v13 = vadd.s32 %v253_v22, %v249_v6  ;;  %vm329_vm7 = vcmp.lt.s32.totalorder %v310_v7, 1 }
  0x44   :  { %vm330_vm8 = vcmp.lt.s32.totalorder %v310_v7, 2  ;;  %v328_v28 = vor.u32 %v327_v23, %v326_v12  ;;  %vm331_vm9 = vcmp.lt.s32.totalorder %v310_v7, 3  ;;  %vm332_vm10 = vcmp.lt.s32.totalorder %v310_v7, 4 }
  0x45   :  { %v333_v27 = vsel %vm329_vm7, %v313_v10, %v316_v15  ;;  %v255_v29 = vadd.s32 536870912, %v254_v13  ;;  %v334_v30 = vsel %vm332_vm10, %v322_v4, 2102212464  ;;  %v337_v31 = vsel %vm329_vm7, %v316_v15, %v319_v16 }
  0x46   :  { %v338_v32 = vsel %vm332_vm10, %v325_v17, 920167782  ;;  %v335_v33 = vsel %vm331_vm9, %v319_v16, %v334_v30  ;;  %v341_v35 = vsel %vm329_vm7, %v319_v16, %v322_v4  ;;  %v342_v36 = vsel %vm332_vm10, %v328_v28, 1326507024 }
  0x47   :  { %v339_v34 = vsel %vm331_vm9, %v322_v4, %v338_v32  ;;  %v812_v37 = vmul.f32 6.2831855, %v149_v5  ;;  %v814_v38 = vshrl.u32 %v255_v29, 30  ;;  %v343_v40 = vsel %vm331_vm9, %v325_v17, %v342_v36 }
  0x48   :  { %v340_v39 = vsel %vm330_vm8, %v337_v31, %v339_v34  ;;  %v817_v41 = vmul.f32 -2.0, %v151_v26  ;;  %v344_v43 = vsel %vm330_vm8, %v341_v35, %v343_v40  ;;  %v336_v51 = vsel %vm330_vm8, %v333_v27, %v335_v33 }
  0x49   :  { %v820_v44 = vmul.u32.u64.low %v345_v18, %v340_v39  ;;  %v821_v45 = vmul.u32.u64.high %v345_v18, %v340_v39, %v820_v44  ;;  %v257_v50 = vshll.u32 %v814_v38, 30  ;;  %v407_v54 = vand.u32 8388607, %v400_v14 }
  0x4a   :  { %v826_v52 = vmul.u32.u64.low %v345_v18, %v344_v43  ;;  %v827_v53 = vmul.u32.u64.high %v345_v18, %v344_v43, %v826_v52  ;;  %vm411_vm11 = vcmp.gt.s32.totalorder %v410_v25, 0  ;;  %v832_v55 = vadd.f32 1.0, %v764_v1 }
  0x4b   :  { %v834_v56 = vsub.s32 %v254_v13, %v257_v50  ;;  %v412_v57 = vsel %vm411_vm11, %v410_v25, 0  ;;  %v503_v59 = vand.u32 2147483647, %v812_v37  ;;  %675 = vrsqrt.f32 %v817_v41 }
  0x4c   :  { %v352_v62 = vmul.u32 %v345_v18, %v336_v51  ;;  %v355_v0 = vadd.s32 1, %v821_v45  ;;  %v414_v2 = vand.u32 31, %v412_v57  ;;  %677 = vlog2.f32 %v783_v42 }
  0x4d   :  { %v260_v3 = vsub.s32 0, %v834_v56  ;;  %vm354_vm12 = vc.u32 %v827_v53, %v820_v44  ;;  %v506_v1 = vand.u32 2139095040, %v812_v37  ;;  %v153_v5 = vmul.f32 0.6931472, %v674_v46 }
  0x4e   :  { %v356_v6 = vsel %vm354_vm12, %v355_v0, %v821_v45  ;;  %v408_v7 = vor.u32 8388608, %v407_v54  ;;  %v415_v8 = vsub.s32 32, %v414_v2  ;;  %v846_v12 = vshrl.u32 %v412_v57, 5 }
  0x4f   :  { %v631_v10 = vmin.u32 %v260_v3, %v834_v56  ;;  %v417_v15 = vshll.u32 %v725_v61, %v414_v2  ;;  %v851_v42 = vand.u32 8388607, %v503_v59  ;;  %v357_v16 = vadd.s32 %v356_v6, %v352_v62 }
  0x50   :  { %v418_v17 = vshrl.u32 %v726_v63, %v415_v8  ;;  %v420_v18 = vshll.u32 %v726_v63, %v414_v2  ;;  %v421_v22 = vshrl.u32 %v727_v9, %v415_v8  ;;  %v423_v23 = vshll.u32 %v727_v9, %v414_v2 }
  0x51   :  { %v262_v4 = vclz %v631_v10  ;;  %v424_v25 = vshrl.u32 %v728_v11, %v415_v8  ;;  %v426_v26 = vshll.u32 %v728_v11, %v414_v2  ;;  %v859_v13 = vmul.f32 -2.0, %v153_v5 }
  0x52   :  { %v358_v28 = vadd.s32 536870912, %v357_v16  ;;  %v427_v27 = vshrl.u32 %v729_v19, %v415_v8  ;;  %v862_v29 = vshll.u32 %v408_v7, 8  ;;  %v250_v30 = vadd.s32 %v790_v49, %v788_v47 }
  0x53   :  { %v632_v31 = vadd.s32 4294967294, %v262_v4  ;;  %v429_v32 = vshll.u32 %v729_v19, %v414_v2  ;;  %v430_v33 = vshrl.u32 %v730_v24, %v415_v8  ;;  %v416_v35 = vshrl.u32 %v725_v61, %v415_v8 }
  0x54   :  { %v868_v34 = vshrl.u32 %v358_v28, 30  ;;  %v419_v36 = vor.u32 %v418_v17, %v417_v15  ;;  %v422_v39 = vor.u32 %v421_v22, %v420_v18  ;;  %v425_v40 = vor.u32 %v424_v25, %v423_v23 }
  0x55   :  { %vm633_vm13 = vcmp.lt.s32.totalorder %v632_v31, 0  ;;  %v428_v43 = vor.u32 %v427_v27, %v426_v26  ;;  %vm432_vm14 = vcmp.lt.s32.totalorder %v846_v12, 1  ;;  %v431_v47 = vor.u32 %v430_v33, %v429_v32 }
  0x56   :  { %v265_v45 = vsel %vm633_vm13, 0, %v632_v31  ;;  %v360_v46 = vshll.u32 %v868_v34, 30  ;;  %vm435_vm15 = vcmp.lt.s32.totalorder %v846_v12, 4  ;;  %vm164_vm0 = vcmp.eq.f32.partialorder %v817_v41, inf }
  0x57   :  { %v266_v49 = vsub.s32 32, %v265_v45  ;;  %v267_v50 = vshll.u32 %v834_v56, %v265_v45  ;;  %v270_v51 = vsub.s32 4294967266, %v265_v45  ;;  %v437_v52 = vsel %vm435_vm15, %v425_v40, 2102212464 }
  0x58   :  { %v878_v54 = vsub.s32 %v357_v16, %v360_v46  ;;  %vm433_vm1 = vcmp.lt.s32.totalorder %v846_v12, 2  ;;  %vm434_vm2 = vcmp.lt.s32.totalorder %v846_v12, 3  ;;  %v676_v57 = vpop.eup %675  ;;  %v436_v2 = vsel %vm432_vm14, %v416_v35, %v419_v36 }
  0x59   :  { %v268_v62 = vshrl.u32 %v250_v30, %v266_v49  ;;  %v271_v0 = vadd.s32 127, %v270_v51  ;;  %v438_v56 = vsel %vm434_vm2, %v422_v39, %v437_v52  ;;  %v678_v3 = vpop.eup %677  ;;  %vm196_vm3 = vcmp.lt.s32.totalorder %v750_v20, 0 }
  0x5a   :  { %v363_v5 = vsub.s32 0, %v878_v54  ;;  %v440_v6 = vsel %vm432_vm14, %v419_v36, %v422_v39  ;;  %v441_v7 = vsel %vm435_vm15, %v428_v43, 920167782  ;;  %v444_v8 = vsel %vm432_vm14, %v422_v39, %v425_v40 }
  0x5b   :  { %vm896_vm4 = vcmp.le.f32.partialorder %v194_v48, 0.7853982  ;;  %v269_v15 = vor.u32 %v268_v62, %v267_v50  ;;  %v272_v16 = vshll.u32 %v271_v0, 23  ;;  %v442_v17 = vsel %vm434_vm2, %v425_v40, %v441_v7 }
  0x5c   :  { %v445_v18 = vsel %vm435_vm15, %v431_v47, 1326507024  ;;  %v163_v22 = vmul.f32 %v676_v57, %v817_v41  ;;  %v635_v4 = vmin.u32 %v363_v5, %v878_v54  ;;  %v439_v23 = vsel %vm433_vm1, %v436_v2, %v438_v56 }
  0x5d   :  { %v507_v48 = vshrl.u32 %v506_v1, 23  ;;  %v273_v25 = vor.u32 4788187, %v272_v16  ;;  %v276_v26 = vcvt.s32.f32 %v269_v15  ;;  %v443_v28 = vsel %vm433_vm1, %v440_v6, %v442_v17 }
  0x5e   :  { %v446_v27 = vsel %vm434_vm2, %v428_v43, %v445_v18  ;;  %v365_v30 = vclz %v635_v4  ;;  %v917_v32 = vmul.u32.u64.low %v862_v29, %v443_v28  ;;  %v918_v33 = vmul.u32.u64.high %v862_v29, %v443_v28, %v917_v32 }
  0x5f   :  { %v447_v31 = vsel %vm433_vm1, %v444_v8, %v446_v27  ;;  %v274_v35 = vand.u32 2147483647, %v273_v25  ;;  %v280_v1 = vsub.s32 4, %v814_v38  ;;  %vm166_vm5 = vcmp.eq.f32.partialorder %v817_v41, 0.0 }
  0x60   :  { %v923_v36 = vmul.u32.u64.low %v862_v29, %v447_v31  ;;  %v924_v39 = vmul.u32.u64.high %v862_v29, %v447_v31, %v923_v36  ;;  %v167_v40 = vand.u32 2147483648, %v817_v41  ;;  %v636_v43 = vadd.s32 4294967294, %v365_v30 }
  0x61   :  { %v642_v45 = vadd.s32 4294967169, %v507_v48  ;;  %v165_v12 = vsel %vm164_vm0, %v817_v41, %v163_v22  ;;  %679 = vrsqrt.f32 %v859_v13  ;;  %v277_v46 = vmul.f32 %v276_v26, %v274_v35 }
  0x62   :  { %vm299_vm6 = vcmp.lt.s32.totalorder %v752_v21, 0  ;;  %v455_v47 = vmul.u32 %v862_v29, %v439_v23  ;;  %v353_v49 = vadd.s32 %v820_v44, %v827_v53  ;;  %vm637_vm7 = vcmp.lt.s32.totalorder %v636_v43, 0 }
  0x63   :  { %v458_v50 = vadd.s32 1, %v918_v33  ;;  %v513_v51 = vadd.s32 1, %v642_v45  ;;  %v278_v52 = vxor.u32 2147483648, %v277_v46  ;;  %v281_v57 = vsel %vm196_vm3, %v280_v1, %v814_v38 }
  0x64   :  { %v368_v62 = vsel %vm637_vm7, 0, %v636_v43  ;;  %vm457_vm8 = vc.u32 %v924_v39, %v917_v32  ;;  %v383_v53 = vsub.s32 4, %v868_v34  ;;  %vm952_vm10 = vcmp.le.f32.partialorder %v297_v58, 0.7853982 }
  0x65   :  { %v369_v0 = vsub.s32 32, %v368_v62  ;;  %v370_v2 = vshll.u32 %v878_v54, %v368_v62  ;;  %v373_v29 = vsub.s32 4294967266, %v368_v62  ;;  %v459_v56 = vsel %vm457_vm8, %v458_v50, %v918_v33 }
  0x66   :  { %v279_v44 = vsel %vm196_vm3, %v278_v52, %v277_v46  ;;  %v460_v5 = vadd.s32 %v459_v56, %v455_v47  ;;  %vm514_vm9 = vcmp.gt.s32.totalorder %v513_v51, 0  ;;  %v283_v15 = vsel %vm896_vm4, 0, %v281_v57 }
  0x67   :  { %v282_v38 = vsel %vm896_vm4, %v750_v20, %v279_v44  ;;  %v371_v54 = vshrl.u32 %v353_v49, %v369_v0  ;;  %v374_v7 = vadd.s32 127, %v373_v29  ;;  %v515_v8 = vsel %vm514_vm9, %v513_v51, 0 }
  0x68   :  { %681 = vcosq.f32 %v282_v38  ;;  %v461_v16 = vadd.s32 536870912, %v460_v5  ;;  %v517_v17 = vand.u32 31, %v515_v8  ;;  %v958_v18 = vmul.f32 0.6931472, %v678_v3 }
  0x69   :  { %683 = vsinq.f32 %v282_v38  ;;  %v372_v22 = vor.u32 %v371_v54, %v370_v2  ;;  %v375_v4 = vshll.u32 %v374_v7, 23  ;;  %v962_v58 = vsel %vm166_vm5, %v167_v40, %v165_v12 }
  0x6a   :  { %v964_v23 = vshrl.u32 %v461_v16, 30  ;;  %v511_v48 = vor.u32 8388608, %v851_v42  ;;  %v518_v25 = vsub.s32 32, %v517_v17  ;;  %v967_v26 = vand.u32 3, %v283_v15 }
  0x6b   :  { %v376_v10 = vor.u32 4788187, %v375_v4  ;;  %v379_v28 = vcvt.s32.f32 %v372_v22  ;;  %v972_v3 = vsel %vm299_vm6, %v383_v53, %v868_v34  ;;  %v520_v41 = vshll.u32 %v725_v61, %v517_v17 }
  0x6c   :  { %v463_v27 = vshll.u32 %v964_v23, 30  ;;  %v523_v30 = vshll.u32 %v726_v63, %v517_v17  ;;  %v529_v31 = vshll.u32 %v728_v11, %v517_v17  ;;  %v521_v42 = vshrl.u32 %v726_v63, %v518_v25 }
  0x6d   :  { %v377_v33 = vand.u32 2147483647, %v376_v10  ;;  %v524_v35 = vshrl.u32 %v727_v9, %v518_v25  ;;  %v530_v1 = vshrl.u32 %v729_v19, %v518_v25  ;;  %v516_v40 = vshrl.u32 %v515_v8, 5 }
  0x6e   :  { %v981_v36 = vsub.s32 %v460_v5, %v463_v27  ;;  %v526_v34 = vshll.u32 %v727_v9, %v517_v17  ;;  %v527_v43 = vshrl.u32 %v728_v11, %v518_v25  ;;  %v985_v45 = vpop.eup %679  ;;  %vm288_vm11 = vcmp.lt.s32.totalorder %v967_v26, 2 }
  0x6f   :  { %vm289_vm12 = vcmp.eq.s32.totalorder %v967_v26, 0  ;;  %vm292_vm13 = vcmp.eq.s32.totalorder %v967_v26, 2  ;;  %v380_v63 = vmul.f32 %v379_v28, %v377_v33  ;;  %v532_v12 = vshll.u32 %v729_v19, %v517_v17 }
  0x70   :  { %vm286_vm14 = vweird.f32 %v750_v20  ;;  %v386_v46 = vsel %vm952_vm10, 0, %v972_v3  ;;  %v466_v9 = vsub.s32 0, %v981_v36  ;;  %v533_v11 = vshrl.u32 %v730_v24, %v518_v25 }
  0x71   :  { %v997_v47 = vshll.u32 %v511_v48, 8  ;;  %v381_v49 = vxor.u32 2147483648, %v380_v63  ;;  %v522_v50 = vor.u32 %v521_v42, %v520_v41  ;;  %v525_v51 = vor.u32 %v524_v35, %v523_v30 }
  0x72   :  { %v531_v52 = vor.u32 %v530_v1, %v529_v31  ;;  %v456_v57 = vadd.s32 %v917_v32, %v924_v39  ;;  %v639_v19 = vmin.u32 %v466_v9, %v981_v36  ;;  %v528_v62 = vor.u32 %v527_v43, %v526_v34 }
  0x73   :  { %vm535_vm15 = vcmp.lt.s32.totalorder %v516_v40, 1  ;;  %v382_v0 = vsel %vm299_vm6, %v381_v49, %v380_v63  ;;  %v519_v2 = vshrl.u32 %v725_v61, %v518_v25  ;;  %v534_v29 = vor.u32 %v533_v11, %v532_v12 }
  0x74   :  { %vm538_vm0 = vcmp.lt.s32.totalorder %v516_v40, 4  ;;  %v385_v24 = vsel %vm952_vm10, %v752_v21, %v382_v0  ;;  %v468_v56 = vclz %v639_v19  ;;  %vm536_vm1 = vcmp.lt.s32.totalorder %v516_v40, 2 }
  0x75   :  { %vm537_vm2 = vcmp.lt.s32.totalorder %v516_v40, 3  ;;  %v682_v44 = vpop.eup %681  ;;  %685 = vcosq.f32 %v385_v24  ;;  %v540_v32 = vsel %vm538_vm0, %v528_v62, 2102212464  ;;  %v543_v39 = vsel %vm535_vm15, %v522_v50, %v525_v51 }
  0x76   :  { %v544_v53 = vsel %vm538_vm0, %v531_v52, 920167782  ;;  %v684_v5 = vpop.eup %683  ;;  %v293_v38 = vxor.u32 2147483648, %v682_v44  ;;  %687 = vsinq.f32 %v385_v24  ;;  %v640_v61 = vadd.s32 4294967294, %v468_v56 }
  0x77   :  { %v547_v54 = vsel %vm535_vm15, %v525_v51, %v528_v62  ;;  %v290_v7 = vxor.u32 2147483648, %v684_v5  ;;  %v539_v6 = vsel %vm535_vm15, %v519_v2, %v522_v50  ;;  %v545_v8 = vsel %vm537_vm2, %v528_v62, %v544_v53 }
  0x78   :  { %v548_v15 = vsel %vm538_vm0, %v534_v29, 1326507024  ;;  %v294_v16 = vsel %vm292_vm13, %v293_v38, %v684_v5  ;;  %vm641_vm3 = vcmp.lt.s32.totalorder %v640_v61, 0  ;;  %v541_v17 = vsel %vm537_vm2, %v525_v51, %v540_v32 }
  0x79   :  { %v549_v22 = vsel %vm537_vm2, %v531_v52, %v548_v15  ;;  %v291_v4 = vsel %vm289_vm12, %v682_v44, %v290_v7  ;;  %v471_v48 = vsel %vm641_vm3, 0, %v640_v61  ;;  %v546_v25 = vsel %vm536_vm1, %v543_v39, %v545_v8 }
  0x7a   :  { %v550_v10 = vsel %vm536_vm1, %v547_v54, %v549_v22  ;;  %v295_v28 = vsel %vm288_vm11, %v291_v4, %v294_v16  ;;  %v472_v3 = vsub.s32 32, %v471_v48  ;;  %v473_v27 = vshll.u32 %v981_v36, %v471_v48 }
  0x7b   :  { %v476_v41 = vsub.s32 4294967266, %v471_v48  ;;  %v296_v30 = vsel %vm286_vm14, nan, %v295_v28  ;;  %v542_v31 = vsel %vm536_vm1, %v539_v6, %v541_v17  ;;  %v137_v26 = vmul.f32 5.9604645e-08, %v832_v55 }
  0x7c   :  { %v1030_v33 = vmul.u32.u64.low %v997_v47, %v550_v10  ;;  %v1031_v42 = vmul.u32.u64.high %v997_v47, %v550_v10, %v1030_v33  ;;  %v474_v35 = vshrl.u32 %v456_v57, %v472_v3  ;;  %v606_v36 = vmul.f32 %v296_v30, %v962_v58 }
  0x7d   :  { %v477_v1 = vadd.s32 127, %v476_v41  ;;  %v1034_v34 = vmul.u32.u64.low %v997_v47, %v546_v25  ;;  %v1035_v43 = vmul.u32.u64.high %v997_v47, %v546_v25, %v1034_v34  ;;  %v390_v63 = vand.u32 3, %v386_v46 }
  0x7e   :  { %v475_v20 = vor.u32 %v474_v35, %v473_v27  ;;  %v1041_v40 = vmul.f32 -2.0, %v958_v18  ;;  %v170_v9 = vmul.f32 %v985_v45, %v859_v13  ;;  %v558_v11 = vmul.u32 %v997_v47, %v542_v31  ;;  %610 = vst [vmem:[#allocation4] sm:$0xff] %v606_v36 }
  0x7f   :  { %v478_v12 = vshll.u32 %v477_v1, 23  ;;  %vm560_vm4 = vc.u32 %v1031_v42, %v1034_v34  ;;  %vm171_vm5 = vcmp.eq.f32.partialorder %v859_v13, inf  ;;  %v561_v58 = vadd.s32 1, %v1035_v43 }
  0x80   :  { %v482_v49 = vcvt.s32.f32 %v475_v20  ;;  %689 = vlog2.f32 %v137_v26  ;;  %vm173_vm6 = vcmp.eq.f32.partialorder %v859_v13, 0.0  ;;  %v174_v46 = vand.u32 2147483648, %v859_v13 }
  0x81   :  { %v479_v55 = vor.u32 4788187, %v478_v12  ;;  %vm395_vm7 = vcmp.eq.s32.totalorder %v390_v63, 2  ;;  %v562_v47 = vsel %vm560_vm4, %v561_v58, %v1035_v43  ;;  %v172_v51 = vsel %vm171_vm5, %v859_v13, %v170_v9 }
  0x82   :  { %v686_v18 = vpop.eup %685  ;;  %vm392_vm8 = vcmp.eq.s32.totalorder %v390_v63, 0  ;;  %v563_v57 = vadd.s32 %v562_v47, %v558_v11  ;;  %691 = vrsqrt.f32 %v1041_v40  ;;  %vm391_vm9 = vcmp.lt.s32.totalorder %v390_v63, 2 }
  0x83   :  { %v480_v45 = vand.u32 2147483647, %v479_v55  ;;  %v688_v50 = vpop.eup %687  ;;  %v396_v52 = vxor.u32 2147483648, %v686_v18  ;;  %vm389_vm10 = vweird.f32 %v752_v21  ;;  %vm402_vm11 = vcmp.lt.s32.totalorder %v760_v60, 0 }
  0x84   :  { %v393_v19 = vxor.u32 2147483648, %v688_v50  ;;  %v564_v2 = vadd.s32 536870912, %v563_v57  ;;  %v175_v29 = vsel %vm173_vm6, %v174_v46, %v172_v51  ;;  %vm1061_vm12 = vcmp.le.f32.partialorder %v400_v14, 0.7853982 }
  0x85   :  { %v483_v62 = vmul.f32 %v482_v49, %v480_v45  ;;  %v397_v0 = vsel %vm395_vm7, %v396_v52, %v688_v50  ;;  %v486_v5 = vsub.s32 4, %v964_v23  ;;  %vm178_vm13 = vcmp.eq.f32.partialorder %v1041_v40, inf }
  0x86   :  { %v394_v24 = vsel %vm392_vm8, %v686_v18, %v393_v19  ;;  %v1065_v39 = vshrl.u32 %v564_v2, 30  ;;  %v559_v25 = vadd.s32 %v1034_v34, %v1031_v42  ;;  %vm180_vm0 = vcmp.eq.f32.partialorder %v1041_v40, 0.0 }
  0x87   :  { %v484_v44 = vxor.u32 2147483648, %v483_v62  ;;  %v398_v32 = vsel %vm391_vm9, %v394_v24, %v397_v0  ;;  %v487_v54 = vsel %vm402_vm11, %v486_v5, %v964_v23  ;;  %v181_v23 = vand.u32 2147483648, %v1041_v40 }
  0x88   :  { %v399_v53 = vsel %vm389_vm10, nan, %v398_v32  ;;  %v566_v38 = vshll.u32 %v1065_v39, 30  ;;  %v489_v15 = vsel %vm1061_vm12, 0, %v487_v54  ;;  %vm492_vm3 = vweird.f32 %v760_v60 }
  0x89   :  { %v485_v21 = vsel %vm402_vm11, %v484_v44, %v483_v62  ;;  %v607_v14 = vmul.f32 %v399_v53, %v175_v29  ;;  %v493_v22 = vand.u32 3, %v489_v15  ;;  %vm505_vm4 = vcmp.lt.s32.totalorder %v812_v37, 0 }
  0x8a   :  { %v488_v13 = vsel %vm1061_vm12, %v760_v60, %v485_v21  ;;  %v567_v61 = vsub.s32 %v563_v57, %v566_v38  ;;  %vm504_vm5 = vcmp.le.f32.partialorder %v503_v59, 0.7853982  ;;  %v589_v45 = vsub.s32 4, %v1065_v39 }
  0x8b   :  { %693 = vcosq.f32 %v488_v13  ;;  %611 = vst [vmem:[#allocation4 + $0x8] sm:$0xff] %v607_v14  ;;  %vm498_vm15 = vcmp.eq.s32.totalorder %v493_v22, 2  ;;  %vm495_vm1 = vcmp.eq.s32.totalorder %v493_v22, 0  ;;  %vm494_vm2 = vcmp.lt.s32.totalorder %v493_v22, 2 }
  0x8c   :  { %695 = vsinq.f32 %v488_v13  ;;  %v569_v7 = vsub.s32 0, %v567_v61  ;;  %v590_v50 = vsel %vm505_vm4, %v589_v45, %v1065_v39  ;;  %vm595_vm11 = vweird.f32 %v812_v37 }
  0x8d   :  { %v690_v6 = vpop.eup %689  ;;  %v592_v51 = vsel %vm504_vm5, 0, %v590_v50 }
  0x8e   :  { %v643_v8 = vmin.u32 %v569_v7, %v567_v61  ;;  %v157_v10 = vmul.f32 0.6931472, %v690_v6  ;;  %v596_v57 = vand.u32 3, %v592_v51 }
  0x8f   :  { %v692_v16 = vpop.eup %691 }
  0x90   :  { %v571_v17 = vclz %v643_v8  ;;  %v177_v48 = vmul.f32 %v692_v16, %v1041_v40  ;;  %v161_v9 = vmul.f32 -2.0, %v157_v10  ;;  %vm601_vm7 = vcmp.eq.s32.totalorder %v596_v57, 2 }
  0x91   :  { %vm598_vm9 = vcmp.eq.s32.totalorder %v596_v57, 0  ;;  %vm597_vm10 = vcmp.lt.s32.totalorder %v596_v57, 2 }
  0x92   :  { %v644_v4 = vadd.s32 4294967294, %v571_v17  ;;  %v179_v33 = vsel %vm178_vm13, %v1041_v40, %v177_v48  ;;  %697 = vrsqrt.f32 %v161_v9  ;;  %vm185_vm6 = vcmp.eq.f32.partialorder %v161_v9, inf }
  0x93   :  { %v182_v26 = vsel %vm180_vm0, %v181_v23, %v179_v33  ;;  %v188_v0 = vand.u32 2147483648, %v161_v9  ;;  %vm187_vm8 = vcmp.eq.f32.partialorder %v161_v9, 0.0 }
  0x94   :  { %vm645_vm14 = vcmp.lt.s32.totalorder %v644_v4, 0 }
  0x95   :  { %v574_v28 = vsel %vm645_vm14, 0, %v644_v4 }
  0x96   :  { %v575_v27 = vsub.s32 32, %v574_v28  ;;  %v576_v41 = vshll.u32 %v567_v61, %v574_v28  ;;  %v579_v30 = vsub.s32 4294967266, %v574_v28 }
  0x98   :  { %v694_v3 = vpop.eup %693  ;;  %v577_v42 = vshrl.u32 %v559_v25, %v575_v27  ;;  %v580_v34 = vadd.s32 127, %v579_v30 }
  0x99   :  { %v696_v31 = vpop.eup %695  ;;  %v499_v35 = vxor.u32 2147483648, %v694_v3 }
  0x9a   :  { %v496_v1 = vxor.u32 2147483648, %v696_v31  ;;  %v578_v63 = vor.u32 %v577_v42, %v576_v41  ;;  %v581_v20 = vshll.u32 %v580_v34, 23 }
  0x9b   :  { %v500_v43 = vsel %vm498_vm15, %v499_v35, %v696_v31 }
  0x9c   :  { %v497_v36 = vsel %vm495_vm1, %v694_v3, %v496_v1  ;;  %v582_v55 = vor.u32 4788187, %v581_v20  ;;  %v585_v49 = vcvt.s32.f32 %v578_v63 }
  0x9d   :  { %v501_v12 = vsel %vm494_vm2, %v497_v36, %v500_v43 }
  0x9e   :  { %v502_v11 = vsel %vm492_vm3, nan, %v501_v12  ;;  %v583_v40 = vand.u32 2147483647, %v582_v55 }
  0x9f   :  { %v608_v58 = vmul.f32 %v502_v11, %v182_v26  ;;  %v698_v52 = vpop.eup %697 }
  0xa0   :  { %v586_v18 = vmul.f32 %v585_v49, %v583_v40  ;;  %v184_v19 = vmul.f32 %v698_v52, %v161_v9 }
  0xa1   :  { %612 = vst [vmem:[#allocation4 + $0x10] sm:$0xff] %v608_v58 }
  0xa2   :  { %v587_v60 = vxor.u32 2147483648, %v586_v18  ;;  %v186_v59 = vsel %vm185_vm6, %v161_v9, %v184_v19 }
  0xa3   :  { %v189_v44 = vsel %vm187_vm8, %v188_v0, %v186_v59 }
  0xa4   :  { %v588_v46 = vsel %vm505_vm4, %v587_v60, %v586_v18 }
  0xa5   :  { %v591_v47 = vsel %vm504_vm5, %v812_v37, %v588_v46 }
  0xa6   :  { %699 = vcosq.f32 %v591_v47 }
  0xa7   :  { %701 = vsinq.f32 %v591_v47 }
  0xb3   :  { %v700_v62 = vpop.eup %699 }
  0xb4   :  { %v702_v2 = vpop.eup %701  ;;  %v602_v29 = vxor.u32 2147483648, %v700_v62 }
  0xb5   :  { %v599_v24 = vxor.u32 2147483648, %v702_v2 }
  0xb6   :  { %v603_v56 = vsel %vm601_vm7, %v602_v29, %v702_v2 }
  0xb7   :  { %v600_v32 = vsel %vm598_vm9, %v700_v62, %v599_v24 }
  0xb8   :  { %v604_v39 = vsel %vm597_vm10, %v600_v32, %v603_v56 }
  0xb9   :  { %v605_v53 = vsel %vm595_vm11, nan, %v604_v39 }
  0xba   :  { %v609_v21 = vmul.f32 %v605_v53, %v189_v44 }
  0xbc   :  { %613 = vst [vmem:[#allocation4 + $0x18] sm:$0xff] %v609_v21 }
  0xbd   :  { %714 = shalt.err (!%p711_p4)
}
  0xbe   :  { %s732_s30 = smov 128   ;;  %s733_s2 = smov 8  }
  0xbf   :  { %625 = dma.vmem_to_hbm [thread:$0]  %s620_s28, 512, %s1098_s1, [#allocation5], %s732_s30, %s732_s30, %s733_s2  }
  0xc0   :  { %723 = dma.done.wait [#allocation5], 512  }
  0xc1   :  { %724 = vsyncadd [#allocation5], 4294966784 }
  0xc2   :  { %629 = vsyncpa [#allocation5], 1 }

</bundles_post_ra>
